<compile_context>
chip_gen: v7x
topology: tpu7x:2x2x1
jax: 0.10.0
libtpu: 0.0.40
codegen_flags: <defaults>
</compile_context>

<pallas_src>
import functools

import jax
import jax.numpy as jnp
from jax.experimental import pallas as pl
from jax.experimental.pallas import tpu as pltpu

_LANE = 128
_SUBLANE = 8


def _round_up(x, m):
    return ((x + m - 1) // m) * m


def _pick_tile(total, preferred, align):
    """Largest multiple of `align` that divides `total` and is <= preferred.

    Falls back to `total` (full-extent block, always legal) if no aligned
    divisor exists.
    """
    t = min(_round_up(preferred, align), total)
    t -= t % align
    while t >= align and total % t:
        t -= align
    return t if (t >= align and total % t == 0) else total


def _vmem_limit(need_bytes):
    # explicit scoped-VMEM budget: 2x headroom, floor 16 MiB, cap 48 MiB (v7x-safe).
    return int(min(max(2 * need_bytes, 16 << 20), 48 << 20))


# ----------------------------------------------------------------------------- kernels


def _pernode_kernel(x_ref, m_ref, o_ref):
    # o[n, j] = sum_f x[n, f] * M[n, f, j]
    # Contraction axis (f) sits on sublanes; output features (j) sit on the 128 lanes,
    # so the reduction is a sublane reduce (no cross-lane XLU reduce).
    x = x_ref[...]                      # (tn, Fin)
    m = m_ref[...]                      # (tn, Fin, Fpad)
    o_ref[...] = jnp.sum(x[:, :, None] * m, axis=1).astype(o_ref.dtype)


def _aggregate_kernel(adj_ref, o_ref, b_ref, out_ref, acc_ref, *, apply_relu):
    # out[i_block] = [relu]( sum_k adj[i_block, k_block] @ o[k_block] + bias )
    k = pl.program_id(1)

    @pl.when(k == 0)
    def _init():
        acc_ref[...] = jnp.zeros_like(acc_ref)

    acc_ref[...] += jnp.dot(adj_ref[...], o_ref[...],
                            preferred_element_type=jnp.float32)

    @pl.when(k == pl.num_programs(1) - 1)
    def _finish():
        r = acc_ref[...] + b_ref[...]
        if apply_relu:
            r = jnp.maximum(r, 0.0)
        out_ref[...] = r.astype(out_ref.dtype)


# ----------------------------------------------------------------------------- wrappers


def _pernode_contract(x, m, *, node_tile):
    """o[n] = x[n] @ M[n] for every node, tiled over node blocks."""
    n, fin = x.shape
    fpad = m.shape[-1]

    # VMEM per node-row: double-buffered M/x/o blocks + the 3-D multiply temporary.
    bytes_per_row = 4 * (3 * fin * fpad + 2 * fin + 2 * fpad)
    budget = 12 << 20
    tn = _pick_tile(n, min(node_tile, max(_SUBLANE, budget // bytes_per_row)),
                    _SUBLANE)

    return pl.pallas_call(
        _pernode_kernel,
        out_shape=jax.ShapeDtypeStruct((n, fpad), jnp.float32),
        grid_spec=pltpu.PrefetchScalarGridSpec(
            num_scalar_prefetch=0,
            grid=(n // tn,),
            in_specs=[
                pl.BlockSpec((tn, fin), lambda i: (i, 0)),
                pl.BlockSpec((tn, fin, fpad), lambda i: (i, 0, 0)),
            ],
            out_specs=pl.BlockSpec((tn, fpad), lambda i: (i, 0)),
        ),
        compiler_params=pltpu.CompilerParams(
            dimension_semantics=("parallel",),
            vmem_limit_bytes=_vmem_limit(tn * bytes_per_row),
        ),
    )(x, m)


def _aggregate(adj, o, bias, *, apply_relu, row_tile, k_tile):
    """out = [relu](adj @ o + bias), K-accumulated tiled matmul."""
    n = adj.shape[0]
    fpad = o.shape[-1]

    budget = 24 << 20
    # shrink node-row tile if the (rows x fpad) activation/accumulator blocks dominate.
    max_rows = max(_SUBLANE, budget // (4 * (2 * k_tile + 5 * fpad)))
    tm = _pick_tile(n, min(row_tile, max_rows), _SUBLANE)
    tk = _pick_tile(n, k_tile, _LANE)

    need = 4 * (2 * tm * tk + 2 * tk * fpad + 3 * tm * fpad + fpad)
    kern = functools.partial(_aggregate_kernel, apply_relu=apply_relu)

    return pl.pallas_call(
        kern,
        out_shape=jax.ShapeDtypeStruct((n, fpad), jnp.float32),
        grid_spec=pltpu.PrefetchScalarGridSpec(
            num_scalar_prefetch=0,
            grid=(n // tm, n // tk),
            in_specs=[
                pl.BlockSpec((tm, tk), lambda i, k: (i, k)),      # adj tile
                pl.BlockSpec((tk, fpad), lambda i, k: (k, 0)),    # o tile (K block)
                pl.BlockSpec((1, fpad), lambda i, k: (0, 0)),     # bias
            ],
            out_specs=pl.BlockSpec((tm, fpad), lambda i, k: (i, 0)),
            scratch_shapes=[pltpu.VMEM((tm, fpad), jnp.float32)],
        ),
        compiler_params=pltpu.CompilerParams(
            dimension_semantics=("parallel", "arbitrary"),
            vmem_limit_bytes=_vmem_limit(need),
        ),
    )(adj, o, bias)


def rgcn_forward(x, adjacency, rel1, rel2, w1, b1, w2, b2,
                 *, node_tile=512, k_tile=512):
    n, _ = x.shape
    hid = w1.shape[-1]
    out_f = w2.shape[-1]

    # --- algebraic pre-fusion (once per call): M[i] = W[i] @ R[i]^T -------------------
    m1 = jnp.einsum('nfk,njk->nfj', w1, rel1)          # (N, Fin, H)
    m2 = jnp.einsum('nhk,njk->nhj', w2, rel2)          # (N, H, Fout)

    # --- pad feature dims to the 128-lane width (lane-dense tiles / unmasked stores) --
    hpad = _round_up(hid, _LANE)
    fpad = _round_up(out_f, _LANE)
    m1 = jnp.pad(m1, ((0, 0), (0, 0), (0, hpad - hid)))
    m2 = jnp.pad(m2, ((0, 0), (0, hpad - hid), (0, fpad - out_f)))
    b1p = jnp.pad(b1.reshape(1, -1), ((0, 0), (0, hpad - hid)))
    b2p = jnp.pad(b2.reshape(1, -1), ((0, 0), (0, fpad - out_f)))

    # --- pad the node dim so tiles divide it exactly (zero pads are inert) ------------
    npad = _round_up(n, node_tile) if n > node_tile else _round_up(n, _SUBLANE)
    xp = jnp.pad(x, ((0, npad - n), (0, 0)))
    adjp = jnp.pad(adjacency, ((0, npad - n), (0, npad - n)))
    m1 = jnp.pad(m1, ((0, npad - n), (0, 0), (0, 0)))
    m2 = jnp.pad(m2, ((0, npad - n), (0, 0), (0, 0)))

    # --- layer 1 -----------------------------------------------------------------------
    o1 = _pernode_contract(xp, m1, node_tile=node_tile)                       # (Np, Hp)
    h = _aggregate(adjp, o1, b1p, apply_relu=True,
                   row_tile=node_tile, k_tile=k_tile)                          # (Np, Hp)
    # --- layer 2 -----------------------------------------------------------------------
    o2 = _pernode_contract(h, m2, node_tile=node_tile)                         # (Np, Fp)
    out = _aggregate(adjp, o2, b2p, apply_relu=False,
                     row_tile=node_tile, k_tile=k_tile)                        # (Np, Fp)

    return out[:n, :out_f]


# ----------------------------------------------------------------------------- test


def _xavier_uniform(key, shape):
    # matches nn.init.xavier_uniform_ fan computation for a 3-D (num_rels, in, out) tensor
    receptive = 1
    for d in shape[2:]:
        receptive *= d
    fan_in = shape[1] * receptive
    fan_out = shape[0] * receptive
    bound = (6.0 / (fan_in + fan_out)) ** 0.5
    return jax.random.uniform(key, shape, jnp.float32, -bound, bound)


def _reference(x, adjacency, rel1, rel2, w1, b1, w2, b2):
    s1 = jnp.einsum('ij,ijk->ik', x, w1)
    o1 = jnp.einsum('ijk,ik->ij', rel1, s1)
    h = jax.nn.relu(adjacency @ o1 + b1)
    s2 = jnp.einsum('ij,ijk->ik', h, w2)
    o2 = jnp.einsum('ijk,ik->ij', rel2, s2)
    return adjacency @ o2 + b2


if __name__ == "__main__":
    # Small shapes consistent with the module: num_rels1 == num_rels2 == N (nodes)
    N, IN_F, HID_F, OUT_F = 8, 16, 32, 16

    key = jax.random.PRNGKey(0)
    k = jax.random.split(key, 6)

    x = jax.random.normal(k[0], (N, IN_F), jnp.float32)
    adjacency = jax.random.uniform(k[1], (N, N), jnp.float32)
    rel1 = jax.random.normal(k[2], (N, HID_F, HID_F), jnp.float32) * 0.1
    rel2 = jax.random.normal(k[3], (N, OUT_F, OUT_F), jnp.float32) * 0.1

    # deterministic parameter init (xavier_uniform weights, zero bias)
    w1 = _xavier_uniform(k[4], (N, IN_F, HID_F))
    b1 = jnp.zeros((HID_F,), jnp.float32)
    w2 = _xavier_uniform(k[5], (N, HID_F, OUT_F))
    b2 = jnp.zeros((OUT_F,), jnp.float32)

    out = rgcn_forward(x, adjacency, rel1, rel2, w1, b1, w2, b2)
    out = jax.block_until_ready(out)

    ref = _reference(x, adjacency, rel1, rel2, w1, b1, w2, b2)
    assert out.shape == (N, OUT_F)
    assert jnp.allclose(out, ref, rtol=1e-4, atol=1e-4), "mismatch vs JAX reference"

    print("KERNEL_OK")
</pallas_src>

<mosaic_0001>
module attributes {stable_mosaic.version = 11 : i64} {
  func.func @_pernode_kernel(%arg0: i32, %arg1: memref<8x16xf32, #tpu.memory_space<vmem>>, %arg2: memref<8x16x128xf32, #tpu.memory_space<vmem>>, %arg3: memref<8x128xf32, #tpu.memory_space<vmem>>) attributes {dimension_semantics = [#tpu.dimension_semantics<parallel>], iteration_bounds = array<i64: 1>, scalar_prefetch = 0 : i64, scratch_operands = 0 : i64, tpu.core_type = #tpu.core_type<tc>, window_params = [{transform_indices = @transform_0, window_bounds = array<i64: 8, 16>}, {transform_indices = @transform_1, window_bounds = array<i64: 8, 16, 128>}, {transform_indices = @transform_2, window_bounds = array<i64: 8, 128>}]} {
    %c0 = arith.constant 0 : index
    %c0_0 = arith.constant 0 : index
    %0 = vector.load %arg1[%c0, %c0_0] : memref<8x16xf32, #tpu.memory_space<vmem>>, vector<8x16xf32>
    %c0_1 = arith.constant 0 : index
    %c0_2 = arith.constant 0 : index
    %c0_3 = arith.constant 0 : index
    %1 = vector.load %arg2[%c0_1, %c0_2, %c0_3] : memref<8x16x128xf32, #tpu.memory_space<vmem>>, vector<8x16x128xf32>
    %2 = vector.shape_cast %0 : vector<8x16xf32> to vector<8x16x1xf32>
    %3 = vector.broadcast %2 : vector<8x16x1xf32> to vector<8x16x128xf32>
    %4 = arith.mulf %3, %1 : vector<8x16x128xf32>
    %cst = arith.constant dense<0.000000e+00> : vector<8x128xf32>
    %5 = vector.multi_reduction <add>, %4, %cst [1] : vector<8x16x128xf32> to vector<8x128xf32>
    %c0_4 = arith.constant 0 : index
    %c0_5 = arith.constant 0 : index
    %6 = vector.load %arg3[%c0_4, %c0_5] : memref<8x128xf32, #tpu.memory_space<vmem>>, vector<8x128xf32>
    tpu.vector_store %arg3[%c0_4, %c0_5], %5 {strides = array<i32>} : memref<8x128xf32, #tpu.memory_space<vmem>>, vector<8x128xf32>,
    return
  }
  func.func @transform_0(%arg0: i32) -> (i32, i32) {
    %c0_i32 = arith.constant 0 : i32
    %c0_i32_0 = arith.constant 0 : i32
    return %arg0, %c0_i32 : i32, i32
  }
  func.func @transform_1(%arg0: i32) -> (i32, i32, i32) {
    %c0_i32 = arith.constant 0 : i32
    %c0_i32_0 = arith.constant 0 : i32
    %c0_i32_1 = arith.constant 0 : i32
    return %arg0, %c0_i32, %c0_i32_0 : i32, i32, i32
  }
  func.func @transform_2(%arg0: i32) -> (i32, i32) {
    %c0_i32 = arith.constant 0 : i32
    %c0_i32_0 = arith.constant 0 : i32
    return %arg0, %c0_i32 : i32, i32
  }
}

</mosaic_0001>

<bundles_post_ra>
// kernel: tpu_custom_call.1
= control target key start
LH: loop header
LB: loop body
LE: loop exit
PB: predicated region body
PF: predicated region fallthrough
CT: control target
= control target key end

     0   :  { %7 = vsyncpa [#allocation3], 0  ;;  %s395_s0 = inlined_call_operand.hbm [shape: f32[8,16], index: 0, kind: input, shape index: {}]   ;;  %s396_s1 = inlined_call_operand.hbm [shape: f32[8,16,128], index: 1, kind: input, shape index: {}]   ;;  %s397_s2 = inlined_call_operand.hbm [shape: f32[8,128], index: 2, kind: output, shape index: {}]  }
   0x1   :  { %8 = vsyncpa [#allocation6], 0 }
   0x2   :  { %9 = vsyncpa [#allocation4], 0  ;;  %s332_s9 = smov [#allocation2]   ;;  %s333_s11 = smov [#allocation5]  }
   0x3   :  { %s16_s10 = sshll.u32 %s332_s9, 4  ;;  %s25_s12 = sshll.u32 %s333_s11, 4  ;;  %s17_s10 = int_to_ptr.vmem [resolvable:$true] %s16_s10  ;;  %s352_s12 = int_to_ptr.vmem [resolvable:$true] %s25_s12 }
   0x4   :  { %s260_s15 = scalar_lea.hbm %s395_s0, 128 }
   0x5   :  { %p261_p0 = scmp.ne.s32.totalorder %s395_s0, %s260_s15  ;;  %p264_p1 = scmp.lt.u32.totalorder %s260_s15, %s395_s0 }
   0x7   :  { %p266_p2 = pnand %p264_p1, %p261_p0 }
   0x9   :  { %269 = shalt.err (!%p266_p2)
}
   0xa   :  { %s270_s20 = scalar_lea.vmem %s17_s10, 128  ;;  %p275_p4 = scmp.lt.s32.totalorder %s17_s10, %s17_s10 }
   0xb   :  { %p271_p3 = scmp.ne.s32.totalorder %s17_s10, %s270_s20  ;;  %p276_p5 = scmp.lt.s32.totalorder %s270_s20, %s270_s20 }
   0xd   :  { %p277_p6 = por %p276_p5, %p275_p4 }
   0xf   :  { %p278_p7 = pnand %p277_p6, %p271_p3 }
  0x11   :  { %281 = shalt.err (!%p278_p7)
}
  0x12   :  { %19 = dma.hbm_to_vmem [thread:$0]  %s395_s0, 128, %s17_s10, [#allocation3]  }
  0x13   :  { %s282_s25 = scalar_lea.hbm %s396_s1, 2048 }
  0x14   :  { %p283_p8 = scmp.ne.s32.totalorder %s396_s1, %s282_s25  ;;  %p286_p9 = scmp.lt.u32.totalorder %s282_s25, %s396_s1 }
  0x16   :  { %p288_p10 = pnand %p286_p9, %p283_p8 }
  0x18   :  { %291 = shalt.err (!%p288_p10)
}
  0x19   :  { %s292_s30 = scalar_lea.vmem %s352_s12, 2048  ;;  %p297_p12 = scmp.lt.s32.totalorder %s352_s12, %s352_s12 }
  0x1a   :  { %p293_p11 = scmp.ne.s32.totalorder %s352_s12, %s292_s30  ;;  %p298_p13 = scmp.lt.s32.totalorder %s292_s30, %s292_s30 }
  0x1c   :  { %p299_p0 = por %p298_p13, %p297_p12 }
  0x1e   :  { %p300_p1 = pnand %p299_p0, %p293_p11 }
  0x20   :  { %303 = shalt.err (!%p300_p1)
}
  0x21   :  { %s334_s0 = smov 128   ;;  %s335_s3 = smov 8  }
  0x22   :  { %31 = dma.hbm_to_vmem [thread:$0]  %s396_s1, 2048, %s352_s12, [#allocation6], %s334_s0, %s334_s0, %s335_s3  }
  0x23   :  { %326 = dma.done.wait [#allocation3], 128  }
  0x24   :  { %327 = vsyncadd [#allocation3], 4294967168 }
  0x25   :  { %328 = dma.done.wait [#allocation6], 2048  }
  0x26   :  { %329 = vsyncadd [#allocation6], 4294965248  ;;  %v55_v0 = vlaneseq  ;;  %v38_v4 = vld [vmem:[#allocation2] sm:$0xff]  ;;  %v40_v23 = vld [vmem:[#allocation5 + $0x8] sm:$0xff]  ;;  %vm223_vm0 = vcmask 1041409   ;;  %vm225_vm1 = vcmask 1042434  }
  0x27   :  { %v42_v21 = vld [vmem:[#allocation5 + $0x18] sm:$0xff]  ;;  %v41_v25 = vld [vmem:[#allocation5 + $0x10] sm:$0xff]  ;;  %v39_v26 = vld [vmem:[#allocation5] sm:$0xff]  ;;  %vm227_vm2 = vcmask 1043459   ;;  %vm229_vm3 = vcmask 1044484   ;;  %vm231_vm4 = vcmask 1045509  }
  0x28   :  { %v56_v1 = vshrl.u32 %v55_v0, 7  ;;  %v44_v28 = vld [vmem:[#allocation5 + $0x28] sm:$0xff]  ;;  %v43_v29 = vld [vmem:[#allocation5 + $0x20] sm:$0xff]  ;;  %v46_v38 = vld [vmem:[#allocation5 + $0x38] sm:$0xff]  ;;  %vm233_vm5 = vcmask 1046534   ;;  %s336_s1 = smov [#allocation7]  }
  0x29   :  { %v45_v40 = vld [vmem:[#allocation5 + $0x30] sm:$0xff]  ;;  %v48_v47 = vld [vmem:[#allocation5 + $0x48] sm:$0xff]  ;;  %v47_v49 = vld [vmem:[#allocation5 + $0x40] sm:$0xff]  ;;  %s245_s6 = sshll.u32 %s336_s1, 4  ;;  %vm235_vm6 = vcmask 1047559   ;;  %s246_s6 = int_to_ptr.vmem [resolvable:$true] %s245_s6 }
  0x2a   :  { %v68_v2 = vsub.s32 1, %v56_v1  ;;  %v57_v3 = vsub.s32 0, %v56_v1  ;;  %v79_v7 = vsub.s32 2, %v56_v1  ;;  %v90_v9 = vsub.s32 3, %v56_v1  ;;  %v50_v58 = vld [vmem:[#allocation5 + $0x58] sm:$0xff]  ;;  %v49_v59 = vld [vmem:[#allocation5 + $0x50] sm:$0xff]  ;;  %p309_p3 = scmp.lt.s32.totalorder %s246_s6, %s246_s6 }
  0x2b   :  { %v101_v11 = vsub.s32 4, %v56_v1  ;;  %v112_v13 = vsub.s32 5, %v56_v1  ;;  %v123_v15 = vsub.s32 6, %v56_v1  ;;  %v134_v17 = vsub.s32 7, %v56_v1  ;;  %s304_s7 = scalar_lea.vmem %s246_s6, 128 }
  0x2c   :  { %v69_v5 = vrot.slane %v38_v4, %v68_v2  ;;  %v58_v6 = vrot.slane %v38_v4, %v57_v3  ;;  %v80_v8 = vrot.slane %v38_v4, %v79_v7  ;;  %v91_v10 = vrot.slane %v38_v4, %v90_v9  ;;  %v51_v7 = vld [vmem:[#allocation5 + $0x60] sm:$0xff]  ;;  %p305_p2 = scmp.ne.s32.totalorder %s246_s6, %s304_s7  ;;  %p310_p4 = scmp.lt.s32.totalorder %s304_s7, %s304_s7 }
  0x2d   :  { %v102_v12 = vrot.slane %v38_v4, %v101_v11  ;;  %v113_v14 = vrot.slane %v38_v4, %v112_v13  ;;  %v124_v16 = vrot.slane %v38_v4, %v123_v15  ;;  %v135_v18 = vrot.slane %v38_v4, %v134_v17 }
  0x2e   :  { %71 = vbcast.lane.b32.xlu1 %v69_v5, 256  ;;  %60 = vbcast.lane.b32.xlu0 %v58_v6, 256  ;;  %p311_p5 = por %p310_p4, %p309_p3 }
  0x30   :  { %p312_p6 = pnand %p311_p5, %p305_p2 }
  0x32   :  { %75 = vbcast.lane.b32.xlu1 %v69_v5, 264  ;;  %64 = vbcast.lane.b32.xlu0 %v58_v6, 264  ;;  %v52_v6 = vld [vmem:[#allocation5 + $0x68] sm:$0xff] }
  0x36   :  { %86 = vbcast.lane.b32.xlu1 %v80_v8, 264  ;;  %82 = vbcast.lane.b32.xlu0 %v80_v8, 256 }
  0x3a   :  { %97 = vbcast.lane.b32.xlu1 %v91_v10, 264  ;;  %93 = vbcast.lane.b32.xlu0 %v91_v10, 256 }
  0x3e   :  { %108 = vbcast.lane.b32.xlu1 %v102_v12, 264  ;;  %104 = vbcast.lane.b32.xlu0 %v102_v12, 256 }
  0x42   :  { %119 = vbcast.lane.b32.xlu1 %v113_v14, 264  ;;  %115 = vbcast.lane.b32.xlu0 %v113_v14, 256 }
  0x46   :  { %130 = vbcast.lane.b32.xlu1 %v124_v16, 264  ;;  %126 = vbcast.lane.b32.xlu0 %v124_v16, 256 }
  0x4a   :  { %141 = vbcast.lane.b32.xlu1 %v135_v18, 264  ;;  %137 = vbcast.lane.b32.xlu0 %v135_v18, 256 }
  0xa0   :  { %v72_v19 = vpop.permute.xlu1 %71  ;;  %v61_v20 = vpop.permute.xlu0 %60 }
  0xa1   :  { %v145_v31 = vmul.f32 %v72_v19, %v41_v25  ;;  %v143_v34 = vmul.f32 %v61_v20, %v39_v26  ;;  %v54_v20 = vld [vmem:[#allocation5 + $0x78] sm:$0xff] }
  0xa4   :  { %v76_v22 = vpop.permute.xlu1 %75  ;;  %v65_v24 = vpop.permute.xlu0 %64 }
  0xa5   :  { %v146_v27 = vmul.f32 %v76_v22, %v42_v21  ;;  %v144_v30 = vmul.f32 %v65_v24, %v40_v23  ;;  %v53_v21 = vld [vmem:[#allocation5 + $0x70] sm:$0xff] }
  0xa7   :  { %v166_v37 = vadd.f32 %v146_v27, %v145_v31  ;;  %v159_v39 = vadd.f32 %v144_v30, %v143_v34 }
  0xa8   :  { %v87_v32 = vpop.permute.xlu1 %86  ;;  %v83_v33 = vpop.permute.xlu0 %82 }
  0xa9   :  { %v148_v35 = vmul.f32 %v87_v32, %v44_v28  ;;  %v147_v36 = vmul.f32 %v83_v33, %v43_v29  ;;  %v167_v45 = vrot.slane %v166_v37, 4  ;;  %v160_v48 = vrot.slane %v159_v39, 4 }
  0xab   :  { %v173_v41 = vadd.f32 %v148_v35, %v147_v36  ;;  %v168_v55 = vadd.f32 %v167_v45, %v166_v37  ;;  %v161_v60 = vadd.f32 %v160_v48, %v159_v39 }
  0xac   :  { %v98_v42 = vpop.permute.xlu1 %97  ;;  %v94_v43 = vpop.permute.xlu0 %93 }
  0xad   :  { %v150_v44 = vmul.f32 %v98_v42, %v46_v38  ;;  %v149_v46 = vmul.f32 %v94_v43, %v45_v40  ;;  %v174_v50 = vrot.slane %v173_v41, 4  ;;  %v169_v4 = vrot.slane %v168_v55, 2 }
  0xae   :  { %v162_v8 = vrot.slane %v161_v60, 2 }
  0xaf   :  { %v180_v51 = vadd.f32 %v150_v44, %v149_v46  ;;  %v175_v61 = vadd.f32 %v174_v50, %v173_v41  ;;  %v170_v18 = vadd.f32 %v169_v4, %v168_v55 }
  0xb0   :  { %v109_v52 = vpop.permute.xlu1 %108  ;;  %v105_v53 = vpop.permute.xlu0 %104  ;;  %v163_v22 = vadd.f32 %v162_v8, %v161_v60 }
  0xb1   :  { %v152_v54 = vmul.f32 %v109_v52, %v48_v47  ;;  %v181_v56 = vrot.slane %v180_v51, 4  ;;  %v151_v57 = vmul.f32 %v105_v53, %v47_v49  ;;  %v176_v10 = vrot.slane %v175_v61, 2 }
  0xb2   :  { %v171_v33 = vrot.slane %v170_v18, 1  ;;  %v164_v35 = vrot.slane %v163_v22, 1 }
  0xb3   :  { %v182_v62 = vadd.f32 %v181_v56, %v180_v51  ;;  %v187_v63 = vadd.f32 %v152_v54, %v151_v57  ;;  %v177_v25 = vadd.f32 %v176_v10, %v175_v61 }
  0xb4   :  { %v120_v0 = vpop.permute.xlu1 %119  ;;  %v116_v1 = vpop.permute.xlu0 %115  ;;  %v172_v43 = vadd.f32 %v171_v33, %v170_v18  ;;  %v165_v45 = vadd.f32 %v164_v35, %v163_v22 }
  0xb5   :  { %v154_v2 = vmul.f32 %v120_v0, %v50_v58  ;;  %v153_v3 = vmul.f32 %v116_v1, %v49_v59  ;;  %v188_v5 = vrot.slane %v187_v63, 4  ;;  %v183_v11 = vrot.slane %v182_v62, 2 }
  0xb6   :  { %v178_v39 = vrot.slane %v177_v25, 1  ;;  %v224_v54 = vsel %vm223_vm0, %v172_v43, %v165_v45 }
  0xb7   :  { %v194_v9 = vadd.f32 %v154_v2, %v153_v3  ;;  %v189_v12 = vadd.f32 %v188_v5, %v187_v63  ;;  %v184_v26 = vadd.f32 %v183_v11, %v182_v62 }
  0xb8   :  { %v131_v13 = vpop.permute.xlu1 %130  ;;  %v127_v14 = vpop.permute.xlu0 %126  ;;  %v179_v49 = vadd.f32 %v178_v39, %v177_v25 }
  0xb9   :  { %v195_v15 = vrot.slane %v194_v9, 4  ;;  %v156_v16 = vmul.f32 %v131_v13, %v52_v6  ;;  %v155_v17 = vmul.f32 %v127_v14, %v51_v7  ;;  %v190_v19 = vrot.slane %v189_v12, 2 }
  0xba   :  { %v185_v40 = vrot.slane %v184_v26, 1  ;;  %v226_v57 = vsel %vm225_vm1, %v179_v49, %v224_v54 }
  0xbb   :  { %v196_v23 = vadd.f32 %v195_v15, %v194_v9  ;;  %v201_v24 = vadd.f32 %v156_v16, %v155_v17  ;;  %v191_v34 = vadd.f32 %v190_v19, %v189_v12 }
  0xbc   :  { %v142_v27 = vpop.permute.xlu1 %141  ;;  %v138_v28 = vpop.permute.xlu0 %137  ;;  %v186_v50 = vadd.f32 %v185_v40, %v184_v26 }
  0xbd   :  { %v197_v29 = vrot.slane %v196_v23, 2  ;;  %v202_v30 = vrot.slane %v201_v24, 4  ;;  %v158_v31 = vmul.f32 %v142_v27, %v54_v20  ;;  %v157_v32 = vmul.f32 %v138_v28, %v53_v21 }
  0xbe   :  { %v192_v44 = vrot.slane %v191_v34, 1  ;;  %v228_v60 = vsel %vm227_vm2, %v186_v50, %v226_v57 }
  0xbf   :  { %v198_v36 = vadd.f32 %v197_v29, %v196_v23  ;;  %v203_v37 = vadd.f32 %v202_v30, %v201_v24  ;;  %v208_v38 = vadd.f32 %v158_v31, %v157_v32 }
  0xc0   :  { %v193_v53 = vadd.f32 %v192_v44, %v191_v34 }
  0xc1   :  { %v204_v41 = vrot.slane %v203_v37, 2  ;;  %v209_v42 = vrot.slane %v208_v38, 4  ;;  %v199_v46 = vrot.slane %v198_v36, 1 }
  0xc2   :  { %v230_v61 = vsel %vm229_vm3, %v193_v53, %v228_v60 }
  0xc3   :  { %v205_v47 = vadd.f32 %v204_v41, %v203_v37  ;;  %v210_v48 = vadd.f32 %v209_v42, %v208_v38  ;;  %v200_v55 = vadd.f32 %v199_v46, %v198_v36 }
  0xc5   :  { %v206_v51 = vrot.slane %v205_v47, 1  ;;  %v211_v52 = vrot.slane %v210_v48, 2  ;;  %v232_v63 = vsel %vm231_vm4, %v200_v55, %v230_v61 }
  0xc7   :  { %v212_v56 = vadd.f32 %v211_v52, %v210_v48  ;;  %v207_v58 = vadd.f32 %v206_v51, %v205_v47 }
  0xc9   :  { %v213_v59 = vrot.slane %v212_v56, 1  ;;  %v234_v0 = vsel %vm233_vm5, %v207_v58, %v232_v63 }
  0xcb   :  { %v214_v62 = vadd.f32 %v213_v59, %v212_v56 }
  0xcd   :  { %v236_v1 = vsel %vm235_vm6, %v214_v62, %v234_v0 }
  0xce   :  { %238 = vst [vmem:[#allocation7] sm:$0xff] %v236_v1 }
  0xcf   :  { %315 = shalt.err (!%p312_p6)
}
  0xd0   :  { %s316_s10 = scalar_lea.hbm %s397_s2, 128 }
  0xd1   :  { %p317_p7 = scmp.ne.s32.totalorder %s397_s2, %s316_s10  ;;  %p320_p8 = scmp.lt.u32.totalorder %s316_s10, %s397_s2 }
  0xd3   :  { %p322_p9 = pnand %p320_p8, %p317_p7 }
  0xd5   :  { %325 = shalt.err (!%p322_p9)
}
  0xd6   :  { %248 = dma.vmem_to_hbm [thread:$0]  %s246_s6, 128, %s397_s2, [#allocation4]  }
  0xd7   :  { %330 = dma.done.wait [#allocation4], 128  }
  0xd8   :  { %331 = vsyncadd [#allocation4], 4294967168 }
  0xd9   :  { %252 = vsyncpa [#allocation3], 1 }
  0xda   :  { %253 = vsyncpa [#allocation6], 1 }
  0xdb   :  { %254 = vsyncpa [#allocation4], 1 }

</bundles_post_ra>
